<compile_context>
chip_gen: v6e
topology: v6e:2x2x1
jax: 0.10.0
libtpu: 0.0.40
codegen_flags: <defaults>
</compile_context>

<pallas_src>
import jax
import jax.numpy as jnp
from jax import lax
from jax.experimental import pallas as pl
from jax.experimental.pallas import tpu as pltpu

HIDDEN = 128
LANE = 128


def _round_up(x, m):
    return ((x + m - 1) // m) * m


def _critic_kernel(x_ref, w1_ref, b1_ref, w2_ref, b2_ref, w3t_ref, b3t_ref, ot_ref):
    # 1/128 input scaling is already folded into w1 (exact power-of-two scale).
    # If the caller already supplies bf16 state, this astype is a no-op.
    x = x_ref[...].astype(jnp.bfloat16)

    # Layer 1: Linear(n_in, 128) + Tanh   (bf16 MXU operands, f32 accumulate)
    h1 = jnp.dot(x, w1_ref[...], preferred_element_type=jnp.float32) + b1_ref[...]
    h1 = jnp.tanh(h1)  # f32 on the VPU/EUP (v5e-safe)
    # TODO(synk): if re-profiling shows EUP-bound on v6e/v7x after the writeback
    # fix, run the two tanh calls in bf16 there (keep f32 for v5e).

    # Layer 2: Linear(128, 128) + Tanh
    h2 = jnp.dot(h1.astype(jnp.bfloat16), w2_ref[...],
                 preferred_element_type=jnp.float32) + b2_ref[...]
    h2 = jnp.tanh(h2)

    # Layer 3 emitted transposed: out.T = w3.T @ h2.T  ->  (n_out_pad8, TM).
    # NT dot_general (both operands contract on their last dim) keeps TM on the
    # lane axis of the output block -> unmasked, contiguous vst.
    out_t = lax.dot_general(
        w3t_ref[...], h2.astype(jnp.bfloat16),
        dimension_numbers=(((1,), (1,)), ((), ())),
        preferred_element_type=jnp.float32) + b3t_ref[...]
    ot_ref[...] = out_t.astype(ot_ref.dtype)


def _choose_tile(b_pad8, *, single_block_rows, max_tm):
    """Pick (TM, final padded batch).  b_pad8 is already a multiple of 8."""
    max_tm = max(LANE, (max_tm // LANE) * LANE)
    if b_pad8 <= single_block_rows:
        return b_pad8, b_pad8                     # one block, grid=(1,)
    lo = min(512, max_tm)
    for tm in range(max_tm, lo - 1, -LANE):       # multiple-of-128 divisors only
        if b_pad8 % tm == 0:
            return tm, b_pad8                     # clean divisor, no extra pad
    # Awkward batch size: pad to a multiple of max_tm (one small copy beats
    # thousands of tiny grid steps).
    return max_tm, _round_up(b_pad8, max_tm)


def critic_forward(state, kparams, *, single_block_rows=4096, max_tm=2048):
    """state: (B, n_inputs) float32 (or bfloat16); kparams: prepare_params() output."""
    b, n_in = state.shape
    n_out = kparams["n_out"]
    n_out_pad8 = kparams["w3t"].shape[0]

    b_pad8 = _round_up(b, 8)
    tm, b_pad = _choose_tile(b_pad8, single_block_rows=single_block_rows, max_tm=max_tm)
    if b_pad != b:
        # Minimal padding (normally <= 7 rows) — no full round-up-to-TM copy.
        state = jnp.pad(state, ((0, b_pad - b), (0, 0)))
    grid = (b_pad // tm,)

    def _resident(shape):
        # Constant index_map -> stays VMEM-resident across grid steps; a single
        # buffer suffices (default double buffer is dead weight for weights).
        return pl.BlockSpec(shape, lambda i: (0, 0), pipeline_mode=pl.Buffered(1))

    out_t = pl.pallas_call(
        _critic_kernel,
        out_shape=jax.ShapeDtypeStruct((n_out_pad8, b_pad), jnp.float32),
        grid=grid,
        in_specs=[
            pl.BlockSpec((tm, n_in), lambda i: (i, 0)),     # state (streamed per block)
            _resident(kparams["w1"].shape),
            _resident(kparams["b1"].shape),
            _resident(kparams["w2"].shape),
            _resident(kparams["b2"].shape),
            _resident(kparams["w3t"].shape),
            _resident(kparams["b3t"].shape),
        ],
        # Transposed output: sublane dim = n_out_pad8 (8), lane dim = TM.
        out_specs=pl.BlockSpec((n_out_pad8, tm), lambda i: (0, i)),
        compiler_params=pltpu.CompilerParams(
            dimension_semantics=("parallel",),              # v7x 2-TC sharding
        ),
    )(
        state,
        kparams["w1"], kparams["b1"],
        kparams["w2"], kparams["b2"],
        kparams["w3t"], kparams["b3t"],
    )
    # Un-transpose + drop sublane/batch padding (tiny: n_out x B).
    return out_t[:n_out, :b].T


def init_params(key, n_inputs, n_outputs):
    """PyTorch-equivalent raw f32 params: uniform(-1/sqrt(fan_in), 1/sqrt(fan_in))."""
    ks = jax.random.split(key, 6)

    def lin(kw, kb, fan_in, fan_out):
        bound = 1.0 / jnp.sqrt(jnp.float32(fan_in))
        w = jax.random.uniform(kw, (fan_in, fan_out), jnp.float32, -bound, bound)
        b = jax.random.uniform(kb, (1, fan_out), jnp.float32, -bound, bound)
        return w, b

    w1, b1 = lin(ks[0], ks[1], n_inputs, HIDDEN)
    w2, b2 = lin(ks[2], ks[3], HIDDEN, HIDDEN)
    w3, b3 = lin(ks[4], ks[5], HIDDEN, n_outputs)
    return {"w1": w1, "b1": b1, "w2": w2, "b2": b2, "w3": w3, "b3": b3}


def prepare_params(raw, n_outputs):
    """One-time transform of PyTorch-equivalent f32 params into kernel-ready params:
       - fold 1/128 input scaling into w1 (exact),
       - cast weights to bf16 (biases stay f32),
       - store the output head TRANSPOSED, zero-padded only to 8 sublanes."""
    n_out_pad8 = _round_up(max(n_outputs, 1), 8)
    w3t = jnp.zeros((n_out_pad8, HIDDEN), jnp.float32).at[:n_outputs, :].set(raw["w3"].T)
    b3t = jnp.zeros((n_out_pad8, 1), jnp.float32).at[:n_outputs, 0].set(raw["b3"][0])
    return {
        "w1": (raw["w1"] * (1.0 / 128.0)).astype(jnp.bfloat16),
        "b1": raw["b1"].astype(jnp.float32),
        "w2": raw["w2"].astype(jnp.bfloat16),
        "b2": raw["b2"].astype(jnp.float32),
        "w3t": w3t.astype(jnp.bfloat16),
        "b3t": b3t,
        "n_out": int(n_outputs),
    }


def reference_forward_f32(state, raw):
    """Exact PyTorch-semantics f32 reference."""
    x = state.astype(jnp.float32) / 128.0
    h1 = jnp.tanh(x @ raw["w1"] + raw["b1"])
    h2 = jnp.tanh(h1 @ raw["w2"] + raw["b2"])
    return h2 @ raw["w3"] + raw["b3"]


def reference_forward_bf16(state, kparams):
    """Pure-JAX reference mimicking the kernel's bf16-operand / f32-accumulate math."""
    x = state.astype(jnp.bfloat16)
    h1 = jnp.tanh(jnp.dot(x, kparams["w1"], preferred_element_type=jnp.float32)
                  + kparams["b1"])
    h2 = jnp.tanh(jnp.dot(h1.astype(jnp.bfloat16), kparams["w2"],
                          preferred_element_type=jnp.float32) + kparams["b2"])
    out_t = lax.dot_general(kparams["w3t"], h2.astype(jnp.bfloat16),
                            dimension_numbers=(((1,), (1,)), ((), ())),
                            preferred_element_type=jnp.float32) + kparams["b3t"]
    return out_t[:kparams["n_out"], :].T


if __name__ == "__main__":
    key = jax.random.PRNGKey(0)
    k_state, k_params = jax.random.split(key)

    batch, n_inputs, n_outputs = 512, 32, 4
    state = jax.random.uniform(k_state, (batch, n_inputs), jnp.float32, 0.0, 255.0)

    raw = init_params(k_params, n_inputs, n_outputs)
    kparams = prepare_params(raw, n_outputs)

    # Path 1: small batch -> single block (TM = 512, grid=(1,)), no padding copy.
    value = jax.block_until_ready(critic_forward(state, kparams))
    assert value.shape == (batch, n_outputs)

    # Tight check vs. a reference with identical bf16/f32 precision.
    ref_bf16 = reference_forward_bf16(state, kparams)
    assert jnp.allclose(value, ref_bf16, atol=1e-3, rtol=1e-3), (
        float(jnp.max(jnp.abs(value - ref_bf16))))

    # Loose check vs. exact PyTorch-semantics f32 math (bf16 weight precision).
    ref_f32 = reference_forward_f32(state, raw)
    assert jnp.allclose(value, ref_f32, atol=5e-2, rtol=5e-2), (
        float(jnp.max(jnp.abs(value - ref_f32))))

    # Path 2: force the streamed multi-block pipeline (TM=128, grid=(4,)) with a
    # batch that is not a multiple of 8 (exercises minimal padding + slicing).
    batch2 = 509
    value2 = jax.block_until_ready(
        critic_forward(state[:batch2], kparams, single_block_rows=128, max_tm=128))
    assert value2.shape == (batch2, n_outputs)
    assert jnp.allclose(value2, ref_bf16[:batch2], atol=1e-3, rtol=1e-3), (
        float(jnp.max(jnp.abs(value2 - ref_bf16[:batch2]))))

    print("KERNEL_OK")
</pallas_src>

<mosaic_0001>
module attributes {stable_mosaic.version = 11 : i64} {
  func.func @_critic_kernel(%arg0: i32, %arg1: memref<512x32xf32, #tpu.memory_space<vmem>>, %arg2: memref<32x128xbf16, #tpu.memory_space<vmem>>, %arg3: memref<1x128xf32, #tpu.memory_space<vmem>>, %arg4: memref<128x128xbf16, #tpu.memory_space<vmem>>, %arg5: memref<1x128xf32, #tpu.memory_space<vmem>>, %arg6: memref<8x128xbf16, #tpu.memory_space<vmem>>, %arg7: memref<8x1xf32, #tpu.memory_space<vmem>>, %arg8: memref<8x512xf32, #tpu.memory_space<vmem>>) attributes {dimension_semantics = [#tpu.dimension_semantics<parallel>], iteration_bounds = array<i64: 1>, scalar_prefetch = 0 : i64, scratch_operands = 0 : i64, tpu.core_type = #tpu.core_type<tc>, window_params = [{transform_indices = @transform_0, window_bounds = array<i64: 512, 32>}, {pipeline_mode = #tpu.pipeline_mode<synchronous>, transform_indices = @transform_1, window_bounds = array<i64: 32, 128>}, {pipeline_mode = #tpu.pipeline_mode<synchronous>, transform_indices = @transform_2, window_bounds = array<i64: 1, 128>}, {pipeline_mode = #tpu.pipeline_mode<synchronous>, transform_indices = @transform_3, window_bounds = array<i64: 128, 128>}, {pipeline_mode = #tpu.pipeline_mode<synchronous>, transform_indices = @transform_4, window_bounds = array<i64: 1, 128>}, {pipeline_mode = #tpu.pipeline_mode<synchronous>, transform_indices = @transform_5, window_bounds = array<i64: 8, 128>}, {pipeline_mode = #tpu.pipeline_mode<synchronous>, transform_indices = @transform_6, window_bounds = array<i64: 8, 1>}, {transform_indices = @transform_7, window_bounds = array<i64: 8, 512>}]} {
    %c0 = arith.constant 0 : index
    %c0_0 = arith.constant 0 : index
    %0 = vector.load %arg1[%c0, %c0_0] : memref<512x32xf32, #tpu.memory_space<vmem>>, vector<512x32xf32>
    %1 = arith.truncf %0 : vector<512x32xf32> to vector<512x32xbf16>
    %c0_1 = arith.constant 0 : index
    %c0_2 = arith.constant 0 : index
    %2 = vector.load %arg2[%c0_1, %c0_2] : memref<32x128xbf16, #tpu.memory_space<vmem>>, vector<32x128xbf16>
    %cst = arith.constant dense<0.000000e+00> : vector<512x128xf32>
    %3 = tpu.matmul %1, %2, %cst {dimension_numbers = #tpu.dot_dimension_numbers<[1], [0], [0], [1], [0, 0, 1, 1], [], []>} : vector<512x32xbf16>, vector<32x128xbf16>, vector<512x128xf32> -> vector<512x128xf32>
    %c0_3 = arith.constant 0 : index
    %c0_4 = arith.constant 0 : index
    %4 = vector.load %arg3[%c0_3, %c0_4] : memref<1x128xf32, #tpu.memory_space<vmem>>, vector<1x128xf32>
    %5 = vector.broadcast %4 : vector<1x128xf32> to vector<512x128xf32>
    %6 = arith.addf %3, %5 : vector<512x128xf32>
    %7 = math.tanh %6 : vector<512x128xf32>
    %8 = arith.truncf %7 : vector<512x128xf32> to vector<512x128xbf16>
    %c0_5 = arith.constant 0 : index
    %c0_6 = arith.constant 0 : index
    %9 = vector.load %arg4[%c0_5, %c0_6] : memref<128x128xbf16, #tpu.memory_space<vmem>>, vector<128x128xbf16>
    %cst_7 = arith.constant dense<0.000000e+00> : vector<512x128xf32>
    %10 = tpu.matmul %8, %9, %cst_7 {dimension_numbers = #tpu.dot_dimension_numbers<[1], [0], [0], [1], [0, 0, 1, 1], [], []>} : vector<512x128xbf16>, vector<128x128xbf16>, vector<512x128xf32> -> vector<512x128xf32>
    %c0_8 = arith.constant 0 : index
    %c0_9 = arith.constant 0 : index
    %11 = vector.load %arg5[%c0_8, %c0_9] : memref<1x128xf32, #tpu.memory_space<vmem>>, vector<1x128xf32>
    %12 = vector.broadcast %11 : vector<1x128xf32> to vector<512x128xf32>
    %13 = arith.addf %10, %12 : vector<512x128xf32>
    %14 = math.tanh %13 : vector<512x128xf32>
    %c0_10 = arith.constant 0 : index
    %c0_11 = arith.constant 0 : index
    %15 = vector.load %arg6[%c0_10, %c0_11] : memref<8x128xbf16, #tpu.memory_space<vmem>>, vector<8x128xbf16>
    %16 = arith.truncf %14 : vector<512x128xf32> to vector<512x128xbf16>
    %cst_12 = arith.constant dense<0.000000e+00> : vector<8x512xf32>
    %17 = tpu.matmul %15, %16, %cst_12 {dimension_numbers = #tpu.dot_dimension_numbers<[1], [1], [0], [0], [0, 0, 1, 0], [], []>} : vector<8x128xbf16>, vector<512x128xbf16>, vector<8x512xf32> -> vector<8x512xf32>
    %c0_13 = arith.constant 0 : index
    %c0_14 = arith.constant 0 : index
    %18 = vector.load %arg7[%c0_13, %c0_14] : memref<8x1xf32, #tpu.memory_space<vmem>>, vector<8x1xf32>
    %19 = vector.broadcast %18 : vector<8x1xf32> to vector<8x512xf32>
    %20 = arith.addf %17, %19 : vector<8x512xf32>
    %c0_15 = arith.constant 0 : index
    %c0_16 = arith.constant 0 : index
    %21 = vector.load %arg8[%c0_15, %c0_16] : memref<8x512xf32, #tpu.memory_space<vmem>>, vector<8x512xf32>
    tpu.vector_store %arg8[%c0_15, %c0_16], %20 {strides = array<i32>} : memref<8x512xf32, #tpu.memory_space<vmem>>, vector<8x512xf32>,
    return
  }
  func.func @transform_0(%arg0: i32) -> (i32, i32) {
    %c0_i32 = arith.constant 0 : i32
    %c0_i32_0 = arith.constant 0 : i32
    return %arg0, %c0_i32 : i32, i32
  }
  func.func @transform_1(%arg0: i32) -> (i32, i32) {
    %c0_i32 = arith.constant 0 : i32
    %c0_i32_0 = arith.constant 0 : i32
    %c0_i32_1 = arith.constant 0 : i32
    return %c0_i32, %c0_i32_0 : i32, i32
  }
  func.func @transform_2(%arg0: i32) -> (i32, i32) {
    %c0_i32 = arith.constant 0 : i32
    %c0_i32_0 = arith.constant 0 : i32
    %c0_i32_1 = arith.constant 0 : i32
    return %c0_i32, %c0_i32_0 : i32, i32
  }
  func.func @transform_3(%arg0: i32) -> (i32, i32) {
    %c0_i32 = arith.constant 0 : i32
    %c0_i32_0 = arith.constant 0 : i32
    %c0_i32_1 = arith.constant 0 : i32
    return %c0_i32, %c0_i32_0 : i32, i32
  }
  func.func @transform_4(%arg0: i32) -> (i32, i32) {
    %c0_i32 = arith.constant 0 : i32
    %c0_i32_0 = arith.constant 0 : i32
    %c0_i32_1 = arith.constant 0 : i32
    return %c0_i32, %c0_i32_0 : i32, i32
  }
  func.func @transform_5(%arg0: i32) -> (i32, i32) {
    %c0_i32 = arith.constant 0 : i32
    %c0_i32_0 = arith.constant 0 : i32
    %c0_i32_1 = arith.constant 0 : i32
    return %c0_i32, %c0_i32_0 : i32, i32
  }
  func.func @transform_6(%arg0: i32) -> (i32, i32) {
    %c0_i32 = arith.constant 0 : i32
    %c0_i32_0 = arith.constant 0 : i32
    %c0_i32_1 = arith.constant 0 : i32
    return %c0_i32, %c0_i32_0 : i32, i32
  }
  func.func @transform_7(%arg0: i32) -> (i32, i32) {
    %c0_i32 = arith.constant 0 : i32
    %c0_i32_0 = arith.constant 0 : i32
    return %c0_i32, %arg0 : i32, i32
  }
}

</mosaic_0001>

<bundles_post_ra>
// kernel: tpu_custom_call.1
= control target key start
LH: loop header
LB: loop body
LE: loop exit
PB: predicated region body
PF: predicated region fallthrough
CT: control target
= control target key end

     0   :  { %vm147_vm0 = vcmask 261120   ;;  %s2396_s0 = inlined_call_operand.vmem [shape: f32[512,32], index: 0, kind: input, shape index: {}]   ;;  %s2397_s1 = inlined_call_operand.vmem [shape: bf16[32,128], index: 1, kind: input, shape index: {}]   ;;  %s2398_s2 = inlined_call_operand.vmem [shape: f32[1,128], index: 2, kind: input, shape index: {}]   ;;  %s2399_s3 = inlined_call_operand.vmem [shape: bf16[128,128], index: 3, kind: input, shape index: {}]   ;;  %s2400_s4 = inlined_call_operand.vmem [shape: f32[1,128], index: 4, kind: input, shape index: {}]   ;;  %s2401_s5 = inlined_call_operand.vmem [shape: bf16[8,128], index: 5, kind: input, shape index: {}]   ;;  %s2402_s6 = inlined_call_operand.vmem [shape: f32[8,1], index: 6, kind: input, shape index: {}]   ;;  %s2403_s7 = inlined_call_operand.hbm [shape: f32[8,512], index: 7, kind: output, shape index: {}]  }
   0x1   :  { %v1497_v0 = vld [vmem:[%s2397_s1 + $0x8] sm:$0xff]   ;;  %v1498_v1 = vld [vmem:[%s2397_s1] sm:$0xff]   ;;  %v30_v5 = vld [vmem:[%s2396_s0 + $0x10] sm:$0xff] }
   0x2   :  { %1346 = vmatprep.subr.bf16.mxu0 %v1497_v0  ;;  %v28_v2 = vld [vmem:[%s2396_s0] sm:$0xff]  ;;  %v29_v3 = vld [vmem:[%s2396_s0 + $0x8] sm:$0xff]  ;;  %v31_v6 = vld [vmem:[%s2396_s0 + $0x18] sm:$0xff] }
   0x3   :  { %1347 = vmatpush3.bf16.msra.mxu0 %v1497_v0  ;;  %v92_v4 = vpack.c.bf16 %v29_v3, %v28_v2  ;;  %v32_v7 = vld [vmem:[%s2396_s0 + $0x20] sm:$0xff]  ;;  %v33_v8 = vld [vmem:[%s2396_s0 + $0x28] sm:$0xff]  ;;  %v93_v9 = vpack.c.bf16 %v31_v6, %v30_v5  ;;  %v34_v11 = vld [vmem:[%s2396_s0 + $0x30] sm:$0xff] }
   0x4   :  { %1348 = vmatprep.subr.bf16.mxu0 %v1498_v1  ;;  %v94_v10 = vpack.c.bf16 %v33_v8, %v32_v7  ;;  %v35_v12 = vld [vmem:[%s2396_s0 + $0x38] sm:$0xff]  ;;  %v36_v13 = vld [vmem:[%s2396_s0 + $0x40] sm:$0xff]  ;;  %v37_v14 = vld [vmem:[%s2396_s0 + $0x48] sm:$0xff] }
   0x5   :  { %1350 = vmatprep.mubr.msk.bf16.mxu0 %vm147_vm0, %v92_v4  ;;  %v95_v15 = vpack.c.bf16 %v35_v12, %v34_v11  ;;  %v96_v16 = vpack.c.bf16 %v37_v14, %v36_v13  ;;  %v38_v17 = vld [vmem:[%s2396_s0 + $0x50] sm:$0xff]  ;;  %v39_v18 = vld [vmem:[%s2396_s0 + $0x58] sm:$0xff]  ;;  %v40_v19 = vld [vmem:[%s2396_s0 + $0x60] sm:$0xff] }
   0x6   :  { %v41_v20 = vld [vmem:[%s2396_s0 + $0x68] sm:$0xff]  ;;  %v97_v21 = vpack.c.bf16 %v39_v18, %v38_v17  ;;  %v1499_v23 = vld [vmem:[%s2399_s3 + $0x38] sm:$0xff]   ;;  %v42_v24 = vld [vmem:[%s2396_s0 + $0x70] sm:$0xff] }
   0x7   :  { %1349 = vmatpush3.bf16.msra.mxu0 %v1498_v1  ;;  %v98_v22 = vpack.c.bf16 %v41_v20, %v40_v19  ;;  %v43_v25 = vld [vmem:[%s2396_s0 + $0x78] sm:$0xff]  ;;  %v1500_v26 = vld [vmem:[%s2399_s3 + $0x30] sm:$0xff]   ;;  %v44_v27 = vld [vmem:[%s2396_s0 + $0x80] sm:$0xff]  ;;  %1414 = vmatprep.subr.bf16.mxu1 %v1499_v23 }
   0x8   :  { %v45_v28 = vld [vmem:[%s2396_s0 + $0x88] sm:$0xff]  ;;  %1415 = vmatpush3.bf16.msra.mxu1 %v1499_v23 }
   0x9   :  { %1416 = vmatprep.subr.bf16.mxu1 %v1500_v26 }
   0xa   :  { %1351 = vmatmul.mubr.msk.bf16.vlgmr.msra.gmra.mxu0 %vm147_vm0, %v93_v9 }
   0xb   :  { %1354 = vmatprep.mubr.msk.bf16.mxu0 %vm147_vm0, %v94_v10 }
  0x12   :  { %1355 = vmatmul.mubr.msk.bf16.gmra.mxu0 %vm147_vm0, %v95_v15 }
  0x13   :  { %1358 = vmatprep.mubr.msk.bf16.mxu0 %vm147_vm0, %v96_v16 }
  0x1a   :  { %1359 = vmatmul.mubr.msk.bf16.gmra.mxu0 %vm147_vm0, %v97_v21 }
  0x1b   :  { %1362 = vmatprep.mubr.msk.bf16.mxu0 %vm147_vm0, %v98_v22 }
  0x1c   :  { %12 = vsyncpa [#allocation3], 0  ;;  %v99_v29 = vpack.c.bf16 %v43_v25, %v42_v24  ;;  %v100_v30 = vpack.c.bf16 %v45_v28, %v44_v27  ;;  %1417 = vmatpush3.bf16.msra.mxu1 %v1500_v26  ;;  %v46_v31 = vld [vmem:[%s2396_s0 + $0x90] sm:$0xff]  ;;  %v47_v32 = vld [vmem:[%s2396_s0 + $0x98] sm:$0xff] }
  0x1d   :  { %v48_v33 = vld [vmem:[%s2396_s0 + $0xa0] sm:$0xff]  ;;  %v49_v34 = vld [vmem:[%s2396_s0 + $0xa8] sm:$0xff]  ;;  %v101_v35 = vpack.c.bf16 %v47_v32, %v46_v31  ;;  %v50_v37 = vld [vmem:[%s2396_s0 + $0xb0] sm:$0xff] }
  0x1e   :  { %v102_v36 = vpack.c.bf16 %v49_v34, %v48_v33  ;;  %v51_v38 = vld [vmem:[%s2396_s0 + $0xb8] sm:$0xff]  ;;  %v52_v39 = vld [vmem:[%s2396_s0 + $0xc0] sm:$0xff]  ;;  %v53_v40 = vld [vmem:[%s2396_s0 + $0xc8] sm:$0xff] }
  0x1f   :  { %v103_v41 = vpack.c.bf16 %v51_v38, %v50_v37  ;;  %v104_v42 = vpack.c.bf16 %v53_v40, %v52_v39  ;;  %v54_v43 = vld [vmem:[%s2396_s0 + $0xd0] sm:$0xff]  ;;  %v55_v44 = vld [vmem:[%s2396_s0 + $0xd8] sm:$0xff]  ;;  %v56_v45 = vld [vmem:[%s2396_s0 + $0xe0] sm:$0xff] }
  0x20   :  { %v57_v46 = vld [vmem:[%s2396_s0 + $0xe8] sm:$0xff]  ;;  %v105_v47 = vpack.c.bf16 %v55_v44, %v54_v43  ;;  %v58_v49 = vld [vmem:[%s2396_s0 + $0xf0] sm:$0xff]  ;;  %v59_v50 = vld [vmem:[%s2396_s0 + $0xf8] sm:$0xff] }
  0x21   :  { %v106_v48 = vpack.c.bf16 %v57_v46, %v56_v45  ;;  %v60_v51 = vld [vmem:[%s2396_s0 + $0x100] sm:$0xff]  ;;  %v61_v52 = vld [vmem:[%s2396_s0 + $0x108] sm:$0xff]  ;;  %v107_v53 = vpack.c.bf16 %v59_v50, %v58_v49  ;;  %v62_v55 = vld [vmem:[%s2396_s0 + $0x110] sm:$0xff] }
  0x22   :  { %1363 = vmatmul.mubr.msk.bf16.gmra.mxu0 %vm147_vm0, %v99_v29  ;;  %v108_v54 = vpack.c.bf16 %v61_v52, %v60_v51  ;;  %v63_v56 = vld [vmem:[%s2396_s0 + $0x118] sm:$0xff]  ;;  %v64_v57 = vld [vmem:[%s2396_s0 + $0x120] sm:$0xff]  ;;  %v65_v58 = vld [vmem:[%s2396_s0 + $0x128] sm:$0xff] }
  0x23   :  { %1366 = vmatprep.mubr.msk.bf16.mxu0 %vm147_vm0, %v100_v30  ;;  %v109_v59 = vpack.c.bf16 %v63_v56, %v62_v55  ;;  %v110_v60 = vpack.c.bf16 %v65_v58, %v64_v57  ;;  %v1501_v61 = vld [vmem:[%s2399_s3 + $0x28] sm:$0xff]   ;;  %v66_v62 = vld [vmem:[%s2396_s0 + $0x130] sm:$0xff]  ;;  %v67_v63 = vld [vmem:[%s2396_s0 + $0x138] sm:$0xff] }
  0x24   :  { %v68_v0 = vld [vmem:[%s2396_s0 + $0x140] sm:$0xff]  ;;  %v69_v1 = vld [vmem:[%s2396_s0 + $0x148] sm:$0xff]  ;;  %1418 = vmatprep.subr.bf16.mxu1 %v1501_v61  ;;  %v111_v2 = vpack.c.bf16 %v67_v63, %v66_v62  ;;  %v1503_v5 = vld [vmem:[%s2399_s3 + $0x18] sm:$0xff]  }
  0x25   :  { %1419 = vmatpush3.bf16.msra.mxu1 %v1501_v61  ;;  %v1502_v3 = vld [vmem:[%s2399_s3 + $0x20] sm:$0xff]   ;;  %v112_v4 = vpack.c.bf16 %v69_v1, %v68_v0  ;;  %v70_v6 = vld [vmem:[%s2396_s0 + $0x150] sm:$0xff]  ;;  %v71_v7 = vld [vmem:[%s2396_s0 + $0x158] sm:$0xff] }
  0x26   :  { %1420 = vmatprep.subr.bf16.mxu1 %v1502_v3  ;;  %v72_v8 = vld [vmem:[%s2396_s0 + $0x160] sm:$0xff]  ;;  %v73_v9 = vld [vmem:[%s2396_s0 + $0x168] sm:$0xff]  ;;  %v113_v10 = vpack.c.bf16 %v71_v7, %v70_v6  ;;  %v1504_v11 = vld [vmem:[%s2399_s3 + $0x10] sm:$0xff]  }
  0x27   :  { %v114_v12 = vpack.c.bf16 %v73_v9, %v72_v8  ;;  %v1505_v13 = vld [vmem:[%s2399_s3 + $0x8] sm:$0xff]   ;;  %v74_v14 = vld [vmem:[%s2396_s0 + $0x170] sm:$0xff]  ;;  %v75_v15 = vld [vmem:[%s2396_s0 + $0x178] sm:$0xff] }
  0x28   :  { %v76_v16 = vld [vmem:[%s2396_s0 + $0x180] sm:$0xff]  ;;  %v77_v17 = vld [vmem:[%s2396_s0 + $0x188] sm:$0xff]  ;;  %v115_v18 = vpack.c.bf16 %v75_v15, %v74_v14  ;;  %v78_v21 = vld [vmem:[%s2396_s0 + $0x190] sm:$0xff] }
  0x29   :  { %1421 = vmatpush3.bf16.msra.mxu1 %v1502_v3  ;;  %v1506_v19 = vld [vmem:[%s2399_s3] sm:$0xff]   ;;  %v116_v20 = vpack.c.bf16 %v77_v17, %v76_v16  ;;  %v79_v22 = vld [vmem:[%s2396_s0 + $0x198] sm:$0xff]  ;;  %v81_v24 = vld [vmem:[%s2396_s0 + $0x1a8] sm:$0xff] }
  0x2a   :  { %1367 = vmatmul.mubr.msk.bf16.gmra.mxu0 %vm147_vm0, %v101_v35  ;;  %1422 = vmatprep.subr.bf16.mxu1 %v1503_v5  ;;  %v80_v23 = vld [vmem:[%s2396_s0 + $0x1a0] sm:$0xff]  ;;  %v117_v25 = vpack.c.bf16 %v79_v22, %v78_v21  ;;  %v82_v27 = vld [vmem:[%s2396_s0 + $0x1b0] sm:$0xff]  ;;  %v83_v28 = vld [vmem:[%s2396_s0 + $0x1b8] sm:$0xff] }
  0x2b   :  { %1370 = vmatprep.mubr.msk.bf16.mxu0 %vm147_vm0, %v102_v36  ;;  %v118_v26 = vpack.c.bf16 %v81_v24, %v80_v23  ;;  %v84_v29 = vld [vmem:[%s2396_s0 + $0x1c0] sm:$0xff]  ;;  %v85_v30 = vld [vmem:[%s2396_s0 + $0x1c8] sm:$0xff]  ;;  %v119_v31 = vpack.c.bf16 %v83_v28, %v82_v27  ;;  %v86_v33 = vld [vmem:[%s2396_s0 + $0x1d0] sm:$0xff] }
  0x2c   :  { %v120_v32 = vpack.c.bf16 %v85_v30, %v84_v29  ;;  %v87_v34 = vld [vmem:[%s2396_s0 + $0x1d8] sm:$0xff]  ;;  %v88_v35 = vld [vmem:[%s2396_s0 + $0x1e0] sm:$0xff]  ;;  %v89_v36 = vld [vmem:[%s2396_s0 + $0x1e8] sm:$0xff] }
  0x2d   :  { %1423 = vmatpush3.bf16.msra.mxu1 %v1503_v5  ;;  %v121_v37 = vpack.c.bf16 %v87_v34, %v86_v33  ;;  %v122_v38 = vpack.c.bf16 %v89_v36, %v88_v35  ;;  %v90_v39 = vld [vmem:[%s2396_s0 + $0x1f0] sm:$0xff]  ;;  %v91_v40 = vld [vmem:[%s2396_s0 + $0x1f8] sm:$0xff]  ;;  %v2084_v43 = vld [vmem:[%s2398_s2] ss:$0 sm:$0xff] }
  0x2e   :  { %1424 = vmatprep.subr.bf16.mxu1 %v1504_v11 }
  0x31   :  { %1425 = vmatpush3.bf16.msra.mxu1 %v1504_v11 }
  0x32   :  { %1371 = vmatmul.mubr.msk.bf16.gmra.mxu0 %vm147_vm0, %v103_v41  ;;  %1426 = vmatprep.subr.bf16.mxu1 %v1505_v13  ;;  %v123_v41 = vpack.c.bf16 %v91_v40, %v90_v39 }
  0x33   :  { %1374 = vmatprep.mubr.msk.bf16.mxu0 %vm147_vm0, %v104_v42 }
  0x35   :  { %1427 = vmatpush3.bf16.msra.mxu1 %v1505_v13 }
  0x36   :  { %1428 = vmatprep.subr.bf16.mxu1 %v1506_v19 }
  0x39   :  { %1429 = vmatpush3.bf16.msra.mxu1 %v1506_v19 }
  0x3a   :  { %1375 = vmatmul.mubr.msk.bf16.gmra.mxu0 %vm147_vm0, %v105_v47 }
  0x3b   :  { %1378 = vmatprep.mubr.msk.bf16.mxu0 %vm147_vm0, %v106_v48 }
  0x42   :  { %1379 = vmatmul.mubr.msk.bf16.gmra.mxu0 %vm147_vm0, %v107_v53 }
  0x43   :  { %1382 = vmatprep.mubr.msk.bf16.mxu0 %vm147_vm0, %v108_v54 }
  0x4a   :  { %1383 = vmatmul.mubr.msk.bf16.gmra.mxu0 %vm147_vm0, %v109_v59 }
  0x4b   :  { %1386 = vmatprep.mubr.msk.bf16.mxu0 %vm147_vm0, %v110_v60 }
  0x52   :  { %1387 = vmatmul.mubr.msk.bf16.gmra.mxu0 %vm147_vm0, %v111_v2 }
  0x53   :  { %1390 = vmatprep.mubr.msk.bf16.mxu0 %vm147_vm0, %v112_v4 }
  0x5a   :  { %1391 = vmatmul.mubr.msk.bf16.gmra.mxu0 %vm147_vm0, %v113_v10 }
  0x5b   :  { %1394 = vmatprep.mubr.msk.bf16.mxu0 %vm147_vm0, %v114_v12 }
  0x62   :  { %1395 = vmatmul.mubr.msk.bf16.gmra.mxu0 %vm147_vm0, %v115_v18 }
  0x63   :  { %1398 = vmatprep.mubr.msk.bf16.mxu0 %vm147_vm0, %v116_v20 }
  0x6a   :  { %1399 = vmatmul.mubr.msk.bf16.gmra.mxu0 %vm147_vm0, %v117_v25 }
  0x6b   :  { %1402 = vmatprep.mubr.msk.bf16.mxu0 %vm147_vm0, %v118_v26 }
  0x72   :  { %1403 = vmatmul.mubr.msk.bf16.gmra.mxu0 %vm147_vm0, %v119_v31 }
  0x73   :  { %1406 = vmatprep.mubr.msk.bf16.mxu0 %vm147_vm0, %v120_v32 }
  0x7a   :  { %1407 = vmatmul.mubr.msk.bf16.gmra.mxu0 %vm147_vm0, %v121_v37 }
  0x7b   :  { %1410 = vmatprep.mubr.msk.bf16.mxu0 %vm147_vm0, %v122_v38 }
  0x82   :  { %1411 = vmatmul.mubr.msk.bf16.gmra.mxu0 %vm147_vm0, %v123_v41 }
  0xca   :  { %v1352_v42 = vpop.f32.mrf.mxu0 }
  0xcb   :  { %v287_v48 = vadd.f32 %v1352_v42, %v2084_v43 }
  0xcc   :  { %v278_v44 = vpop.f32.mrf.mxu0 }
  0xcd   :  { %v279_v45 = vadd.f32 %v2084_v43, %v278_v44 }
  0xce   :  { %v1353_v46 = vpop.f32.mrf.mxu0 }
  0xcf   :  { %v290_v47 = vadd.f32 %v1353_v46, %v2084_v43  ;;  %1507 = vtanh.f32 %v279_v45 }
  0xd0   :  { %v281_v49 = vpop.f32.mrf.mxu0 }
  0xd1   :  { %v282_v50 = vadd.f32 %v2084_v43, %v281_v49  ;;  %1509 = vtanh.f32 %v290_v47 }
  0xd2   :  { %v1356_v51 = vpop.f32.mrf.mxu0 }
  0xd3   :  { %1511 = vtanh.f32 %v282_v50  ;;  %v303_v56 = vadd.f32 %v1356_v51, %v2084_v43 }
  0xd4   :  { %1513 = vtanh.f32 %v287_v48  ;;  %v294_v52 = vpop.f32.mrf.mxu0 }
  0xd5   :  { %v295_v53 = vadd.f32 %v2084_v43, %v294_v52 }
  0xd6   :  { %v1357_v54 = vpop.f32.mrf.mxu0 }
  0xd7   :  { %v306_v55 = vadd.f32 %v1357_v54, %v2084_v43  ;;  %1515 = vtanh.f32 %v295_v53 }
  0xd8   :  { %v297_v57 = vpop.f32.mrf.mxu0 }
  0xd9   :  { %v298_v58 = vadd.f32 %v2084_v43, %v297_v57  ;;  %1517 = vtanh.f32 %v306_v55 }
  0xda   :  { %v1360_v59 = vpop.f32.mrf.mxu0 }
  0xdb   :  { %1519 = vtanh.f32 %v298_v58  ;;  %v319_v3 = vadd.f32 %v1360_v59, %v2084_v43 }
  0xdc   :  { %1521 = vtanh.f32 %v303_v56  ;;  %v310_v60 = vpop.f32.mrf.mxu0  ;;  %v1508_v62 = vpop.eup %1507 }
  0xdd   :  { %v311_v61 = vadd.f32 %v2084_v43, %v310_v60 }
  0xde   :  { %v1361_v63 = vpop.f32.mrf.mxu0  ;;  %v1510_v0 = vpop.eup %1509 }
  0xdf   :  { %v322_v1 = vadd.f32 %v1361_v63, %v2084_v43  ;;  %1523 = vtanh.f32 %v311_v61 }
  0xe0   :  { %v1512_v2 = vpop.eup %1511  ;;  %v313_v4 = vpop.f32.mrf.mxu0 }
  0xe1   :  { %v1514_v5 = vpop.eup %1513  ;;  %v314_v6 = vadd.f32 %v2084_v43, %v313_v4  ;;  %v597_v7 = vpack.c.bf16 %v1512_v2, %v1508_v62  ;;  %1525 = vtanh.f32 %v322_v1 }
  0xe2   :  { %v1364_v8 = vpop.f32.mrf.mxu0  ;;  %v598_v9 = vpack.c.bf16 %v1510_v0, %v1514_v5 }
  0xe3   :  { %1527 = vtanh.f32 %v314_v6  ;;  %1430 = vmatprep.mubr.bf16.mxu1 %v597_v7  ;;  %v335_v17 = vadd.f32 %v1364_v8, %v2084_v43 }
  0xe4   :  { %1529 = vtanh.f32 %v319_v3  ;;  %v326_v10 = vpop.f32.mrf.mxu0  ;;  %1431 = vmatmul.mubr.bf16.vlgmr.msra.gmra.mxu1 %v598_v9  ;;  %v1516_v12 = vpop.eup %1515 }
  0xe5   :  { %v327_v11 = vadd.f32 %v2084_v43, %v326_v10 }
  0xe6   :  { %v1365_v13 = vpop.f32.mrf.mxu0  ;;  %v1518_v14 = vpop.eup %1517 }
  0xe7   :  { %v338_v15 = vadd.f32 %v1365_v13, %v2084_v43  ;;  %1531 = vtanh.f32 %v327_v11 }
  0xe8   :  { %v1520_v16 = vpop.eup %1519  ;;  %v329_v18 = vpop.f32.mrf.mxu0 }
  0xe9   :  { %v1522_v19 = vpop.eup %1521  ;;  %v330_v20 = vadd.f32 %v2084_v43, %v329_v18  ;;  %v599_v21 = vpack.c.bf16 %v1520_v16, %v1516_v12  ;;  %1533 = vtanh.f32 %v338_v15 }
  0xea   :  { %v1368_v22 = vpop.f32.mrf.mxu0  ;;  %v600_v23 = vpack.c.bf16 %v1518_v14, %v1522_v19 }
  0xeb   :  { %1535 = vtanh.f32 %v330_v20  ;;  %1434 = vmatprep.mubr.bf16.mxu1 %v599_v21  ;;  %v351_v31 = vadd.f32 %v1368_v22, %v2084_v43 }
  0xec   :  { %1537 = vtanh.f32 %v335_v17  ;;  %v342_v24 = vpop.f32.mrf.mxu0  ;;  %1435 = vmatmul.mubr.bf16.gmra.mxu1 %v600_v23  ;;  %v1524_v26 = vpop.eup %1523 }
  0xed   :  { %v343_v25 = vadd.f32 %v2084_v43, %v342_v24 }
  0xee   :  { %v1369_v27 = vpop.f32.mrf.mxu0  ;;  %v1526_v28 = vpop.eup %1525 }
  0xef   :  { %v354_v29 = vadd.f32 %v1369_v27, %v2084_v43  ;;  %1539 = vtanh.f32 %v343_v25 }
  0xf0   :  { %v1528_v30 = vpop.eup %1527  ;;  %v345_v32 = vpop.f32.mrf.mxu0 }
  0xf1   :  { %v1530_v33 = vpop.eup %1529  ;;  %v346_v34 = vadd.f32 %v2084_v43, %v345_v32  ;;  %v601_v35 = vpack.c.bf16 %v1528_v30, %v1524_v26  ;;  %1541 = vtanh.f32 %v354_v29 }
  0xf2   :  { %v1372_v36 = vpop.f32.mrf.mxu0  ;;  %v602_v37 = vpack.c.bf16 %v1526_v28, %v1530_v33 }
  0xf3   :  { %1543 = vtanh.f32 %v346_v34  ;;  %1438 = vmatprep.mubr.bf16.mxu1 %v601_v35  ;;  %v367_v46 = vadd.f32 %v1372_v36, %v2084_v43 }
  0xf4   :  { %1545 = vtanh.f32 %v351_v31  ;;  %v358_v38 = vpop.f32.mrf.mxu0  ;;  %1439 = vmatmul.mubr.bf16.gmra.mxu1 %v602_v37  ;;  %v1532_v40 = vpop.eup %1531 }
  0xf5   :  { %v359_v39 = vadd.f32 %v2084_v43, %v358_v38 }
  0xf6   :  { %v1373_v41 = vpop.f32.mrf.mxu0  ;;  %v1534_v42 = vpop.eup %1533 }
  0xf7   :  { %v370_v44 = vadd.f32 %v1373_v41, %v2084_v43  ;;  %1547 = vtanh.f32 %v359_v39 }
  0xf8   :  { %v1536_v45 = vpop.eup %1535  ;;  %v361_v47 = vpop.f32.mrf.mxu0 }
  0xf9   :  { %v1538_v48 = vpop.eup %1537  ;;  %v362_v49 = vadd.f32 %v2084_v43, %v361_v47  ;;  %v603_v50 = vpack.c.bf16 %v1536_v45, %v1532_v40  ;;  %1549 = vtanh.f32 %v370_v44 }
  0xfa   :  { %v1376_v51 = vpop.f32.mrf.mxu0  ;;  %v604_v52 = vpack.c.bf16 %v1534_v42, %v1538_v48 }
  0xfb   :  { %1551 = vtanh.f32 %v362_v49  ;;  %1442 = vmatprep.mubr.bf16.mxu1 %v603_v50  ;;  %v383_v60 = vadd.f32 %v1376_v51, %v2084_v43 }
  0xfc   :  { %1553 = vtanh.f32 %v367_v46  ;;  %v374_v53 = vpop.f32.mrf.mxu0  ;;  %1443 = vmatmul.mubr.bf16.gmra.mxu1 %v604_v52  ;;  %v1540_v55 = vpop.eup %1539 }
  0xfd   :  { %v375_v54 = vadd.f32 %v2084_v43, %v374_v53 }
  0xfe   :  { %v1377_v56 = vpop.f32.mrf.mxu0  ;;  %v1542_v57 = vpop.eup %1541 }
  0xff   :  { %v386_v58 = vadd.f32 %v1377_v56, %v2084_v43  ;;  %1555 = vtanh.f32 %v375_v54 }
 0x100   :  { %v1544_v59 = vpop.eup %1543  ;;  %v377_v61 = vpop.f32.mrf.mxu0 }
 0x101   :  { %v1546_v62 = vpop.eup %1545  ;;  %v378_v63 = vadd.f32 %v2084_v43, %v377_v61  ;;  %v605_v0 = vpack.c.bf16 %v1544_v59, %v1540_v55  ;;  %1557 = vtanh.f32 %v386_v58 }
 0x102   :  { %v1380_v1 = vpop.f32.mrf.mxu0  ;;  %v606_v2 = vpack.c.bf16 %v1542_v57, %v1546_v62 }
 0x103   :  { %1559 = vtanh.f32 %v378_v63  ;;  %1446 = vmatprep.mubr.bf16.mxu1 %v605_v0  ;;  %v399_v10 = vadd.f32 %v1380_v1, %v2084_v43 }
 0x104   :  { %1561 = vtanh.f32 %v383_v60  ;;  %v390_v3 = vpop.f32.mrf.mxu0  ;;  %1447 = vmatmul.mubr.bf16.gmra.mxu1 %v606_v2  ;;  %v1548_v5 = vpop.eup %1547 }
 0x105   :  { %v391_v4 = vadd.f32 %v2084_v43, %v390_v3 }
 0x106   :  { %v1381_v6 = vpop.f32.mrf.mxu0  ;;  %v1550_v7 = vpop.eup %1549 }
 0x107   :  { %v402_v8 = vadd.f32 %v1381_v6, %v2084_v43  ;;  %1563 = vtanh.f32 %v391_v4 }
 0x108   :  { %v1552_v9 = vpop.eup %1551  ;;  %v393_v11 = vpop.f32.mrf.mxu0 }
 0x109   :  { %v1554_v12 = vpop.eup %1553  ;;  %v394_v13 = vadd.f32 %v2084_v43, %v393_v11  ;;  %v607_v14 = vpack.c.bf16 %v1552_v9, %v1548_v5  ;;  %1565 = vtanh.f32 %v402_v8 }
 0x10a   :  { %v1384_v15 = vpop.f32.mrf.mxu0  ;;  %v608_v16 = vpack.c.bf16 %v1550_v7, %v1554_v12 }
 0x10b   :  { %1567 = vtanh.f32 %v394_v13  ;;  %1450 = vmatprep.mubr.bf16.mxu1 %v607_v14  ;;  %v415_v24 = vadd.f32 %v1384_v15, %v2084_v43 }
 0x10c   :  { %1569 = vtanh.f32 %v399_v10  ;;  %v406_v17 = vpop.f32.mrf.mxu0  ;;  %1451 = vmatmul.mubr.bf16.gmra.mxu1 %v608_v16  ;;  %v1556_v19 = vpop.eup %1555 }
 0x10d   :  { %v407_v18 = vadd.f32 %v2084_v43, %v406_v17 }
 0x10e   :  { %v1385_v20 = vpop.f32.mrf.mxu0  ;;  %v1558_v21 = vpop.eup %1557 }
 0x10f   :  { %v418_v22 = vadd.f32 %v1385_v20, %v2084_v43  ;;  %1571 = vtanh.f32 %v407_v18 }
 0x110   :  { %v1560_v23 = vpop.eup %1559  ;;  %v409_v25 = vpop.f32.mrf.mxu0 }
 0x111   :  { %v1562_v26 = vpop.eup %1561  ;;  %v410_v27 = vadd.f32 %v2084_v43, %v409_v25  ;;  %v609_v28 = vpack.c.bf16 %v1560_v23, %v1556_v19  ;;  %1573 = vtanh.f32 %v418_v22 }
 0x112   :  { %v1388_v29 = vpop.f32.mrf.mxu0  ;;  %v610_v30 = vpack.c.bf16 %v1558_v21, %v1562_v26 }
 0x113   :  { %1575 = vtanh.f32 %v410_v27  ;;  %1454 = vmatprep.mubr.bf16.mxu1 %v609_v28  ;;  %v431_v38 = vadd.f32 %v1388_v29, %v2084_v43 }
 0x114   :  { %1577 = vtanh.f32 %v415_v24  ;;  %v422_v31 = vpop.f32.mrf.mxu0  ;;  %1455 = vmatmul.mubr.bf16.gmra.mxu1 %v610_v30  ;;  %v1564_v33 = vpop.eup %1563 }
 0x115   :  { %v423_v32 = vadd.f32 %v2084_v43, %v422_v31 }
 0x116   :  { %v1389_v34 = vpop.f32.mrf.mxu0  ;;  %v1566_v35 = vpop.eup %1565 }
 0x117   :  { %v434_v36 = vadd.f32 %v1389_v34, %v2084_v43  ;;  %1579 = vtanh.f32 %v423_v32 }
 0x118   :  { %v1568_v37 = vpop.eup %1567  ;;  %v425_v39 = vpop.f32.mrf.mxu0 }
 0x119   :  { %v1570_v40 = vpop.eup %1569  ;;  %v426_v41 = vadd.f32 %v2084_v43, %v425_v39  ;;  %v611_v42 = vpack.c.bf16 %v1568_v37, %v1564_v33  ;;  %1581 = vtanh.f32 %v434_v36 }
 0x11a   :  { %v1392_v44 = vpop.f32.mrf.mxu0  ;;  %v612_v45 = vpack.c.bf16 %v1566_v35, %v1570_v40 }
 0x11b   :  { %1583 = vtanh.f32 %v426_v41  ;;  %1458 = vmatprep.mubr.bf16.mxu1 %v611_v42  ;;  %v447_v53 = vadd.f32 %v1392_v44, %v2084_v43 }
 0x11c   :  { %1585 = vtanh.f32 %v431_v38  ;;  %v438_v46 = vpop.f32.mrf.mxu0  ;;  %1459 = vmatmul.mubr.bf16.gmra.mxu1 %v612_v45  ;;  %v1572_v48 = vpop.eup %1571 }
 0x11d   :  { %v439_v47 = vadd.f32 %v2084_v43, %v438_v46 }
 0x11e   :  { %v1393_v49 = vpop.f32.mrf.mxu0  ;;  %v1574_v50 = vpop.eup %1573 }
 0x11f   :  { %v450_v51 = vadd.f32 %v1393_v49, %v2084_v43  ;;  %1587 = vtanh.f32 %v439_v47 }
 0x120   :  { %v1576_v52 = vpop.eup %1575  ;;  %v441_v54 = vpop.f32.mrf.mxu0 }
 0x121   :  { %v1578_v55 = vpop.eup %1577  ;;  %v442_v56 = vadd.f32 %v2084_v43, %v441_v54  ;;  %v613_v57 = vpack.c.bf16 %v1576_v52, %v1572_v48  ;;  %1589 = vtanh.f32 %v450_v51 }
 0x122   :  { %v1396_v58 = vpop.f32.mrf.mxu0  ;;  %v614_v59 = vpack.c.bf16 %v1574_v50, %v1578_v55 }
 0x123   :  { %1591 = vtanh.f32 %v442_v56  ;;  %1462 = vmatprep.mubr.bf16.mxu1 %v613_v57  ;;  %v463_v3 = vadd.f32 %v1396_v58, %v2084_v43 }
 0x124   :  { %1593 = vtanh.f32 %v447_v53  ;;  %v454_v60 = vpop.f32.mrf.mxu0  ;;  %1463 = vmatmul.mubr.bf16.gmra.mxu1 %v614_v59  ;;  %v1580_v62 = vpop.eup %1579 }
 0x125   :  { %v455_v61 = vadd.f32 %v2084_v43, %v454_v60 }
 0x126   :  { %v1397_v63 = vpop.f32.mrf.mxu0  ;;  %v1582_v0 = vpop.eup %1581 }
 0x127   :  { %v466_v1 = vadd.f32 %v1397_v63, %v2084_v43  ;;  %1595 = vtanh.f32 %v455_v61 }
 0x128   :  { %v1584_v2 = vpop.eup %1583  ;;  %v457_v4 = vpop.f32.mrf.mxu0 }
 0x129   :  { %v1586_v5 = vpop.eup %1585  ;;  %v458_v6 = vadd.f32 %v2084_v43, %v457_v4  ;;  %v615_v7 = vpack.c.bf16 %v1584_v2, %v1580_v62  ;;  %1597 = vtanh.f32 %v466_v1 }
 0x12a   :  { %v1400_v8 = vpop.f32.mrf.mxu0  ;;  %v616_v9 = vpack.c.bf16 %v1582_v0, %v1586_v5 }
 0x12b   :  { %1599 = vtanh.f32 %v458_v6  ;;  %1466 = vmatprep.mubr.bf16.mxu1 %v615_v7  ;;  %v479_v17 = vadd.f32 %v1400_v8, %v2084_v43 }
 0x12c   :  { %1601 = vtanh.f32 %v463_v3  ;;  %v470_v10 = vpop.f32.mrf.mxu0  ;;  %1467 = vmatmul.mubr.bf16.gmra.mxu1 %v616_v9  ;;  %v1588_v12 = vpop.eup %1587 }
 0x12d   :  { %v471_v11 = vadd.f32 %v2084_v43, %v470_v10 }
 0x12e   :  { %v1401_v13 = vpop.f32.mrf.mxu0  ;;  %v1590_v14 = vpop.eup %1589 }
 0x12f   :  { %v482_v15 = vadd.f32 %v1401_v13, %v2084_v43  ;;  %1603 = vtanh.f32 %v471_v11  ;;  %v2153_v13 = vld [vmem:[%s2400_s4] ss:$0 sm:$0xff] }
 0x130   :  { %v1592_v16 = vpop.eup %1591  ;;  %v473_v18 = vpop.f32.mrf.mxu0 }
 0x131   :  { %v1594_v19 = vpop.eup %1593  ;;  %v474_v20 = vadd.f32 %v2084_v43, %v473_v18  ;;  %v617_v21 = vpack.c.bf16 %v1592_v16, %v1588_v12  ;;  %1605 = vtanh.f32 %v482_v15 }
 0x132   :  { %v1404_v22 = vpop.f32.mrf.mxu0  ;;  %v618_v23 = vpack.c.bf16 %v1590_v14, %v1594_v19 }
 0x133   :  { %1607 = vtanh.f32 %v474_v20  ;;  %1470 = vmatprep.mubr.bf16.mxu1 %v617_v21  ;;  %v495_v31 = vadd.f32 %v1404_v22, %v2084_v43 }
 0x134   :  { %1609 = vtanh.f32 %v479_v17  ;;  %v486_v24 = vpop.f32.mrf.mxu0  ;;  %1471 = vmatmul.mubr.bf16.gmra.mxu1 %v618_v23  ;;  %v1596_v26 = vpop.eup %1595 }
 0x135   :  { %v487_v25 = vadd.f32 %v2084_v43, %v486_v24 }
 0x136   :  { %v1405_v27 = vpop.f32.mrf.mxu0  ;;  %v1598_v28 = vpop.eup %1597 }
 0x137   :  { %v498_v29 = vadd.f32 %v1405_v27, %v2084_v43  ;;  %1611 = vtanh.f32 %v487_v25 }
 0x138   :  { %v1600_v30 = vpop.eup %1599  ;;  %v489_v32 = vpop.f32.mrf.mxu0 }
 0x139   :  { %v1602_v33 = vpop.eup %1601  ;;  %v490_v34 = vadd.f32 %v2084_v43, %v489_v32  ;;  %v619_v35 = vpack.c.bf16 %v1600_v30, %v1596_v26  ;;  %1613 = vtanh.f32 %v498_v29 }
 0x13a   :  { %v1408_v36 = vpop.f32.mrf.mxu0  ;;  %v620_v37 = vpack.c.bf16 %v1598_v28, %v1602_v33 }
 0x13b   :  { %1615 = vtanh.f32 %v490_v34  ;;  %1474 = vmatprep.mubr.bf16.mxu1 %v619_v35  ;;  %v511_v46 = vadd.f32 %v1408_v36, %v2084_v43 }
 0x13c   :  { %1617 = vtanh.f32 %v495_v31  ;;  %v502_v38 = vpop.f32.mrf.mxu0  ;;  %1475 = vmatmul.mubr.bf16.gmra.mxu1 %v620_v37  ;;  %v1604_v40 = vpop.eup %1603 }
 0x13d   :  { %v503_v39 = vadd.f32 %v2084_v43, %v502_v38 }
 0x13e   :  { %v1409_v41 = vpop.f32.mrf.mxu0  ;;  %v1606_v42 = vpop.eup %1605 }
 0x13f   :  { %v514_v44 = vadd.f32 %v1409_v41, %v2084_v43  ;;  %1619 = vtanh.f32 %v503_v39 }
 0x140   :  { %v1608_v45 = vpop.eup %1607  ;;  %v505_v47 = vpop.f32.mrf.mxu0 }
 0x141   :  { %v1610_v48 = vpop.eup %1609  ;;  %v506_v49 = vadd.f32 %v2084_v43, %v505_v47  ;;  %v621_v50 = vpack.c.bf16 %v1608_v45, %v1604_v40  ;;  %1621 = vtanh.f32 %v514_v44 }
 0x142   :  { %v1412_v51 = vpop.f32.mrf.mxu0  ;;  %v622_v52 = vpack.c.bf16 %v1606_v42, %v1610_v48 }
 0x143   :  { %1623 = vtanh.f32 %v506_v49  ;;  %1478 = vmatprep.mubr.bf16.mxu1 %v621_v50  ;;  %v527_v60 = vadd.f32 %v1412_v51, %v2084_v43 }
 0x144   :  { %1625 = vtanh.f32 %v511_v46  ;;  %v518_v53 = vpop.f32.mrf.mxu0  ;;  %1479 = vmatmul.mubr.bf16.gmra.mxu1 %v622_v52  ;;  %v1612_v55 = vpop.eup %1611 }
 0x145   :  { %v519_v54 = vadd.f32 %v2084_v43, %v518_v53 }
 0x146   :  { %v1413_v56 = vpop.f32.mrf.mxu0  ;;  %v1614_v57 = vpop.eup %1613 }
 0x147   :  { %v530_v58 = vadd.f32 %v1413_v56, %v2084_v43  ;;  %1627 = vtanh.f32 %v519_v54 }
 0x148   :  { %v1616_v59 = vpop.eup %1615  ;;  %v521_v61 = vpop.f32.mrf.mxu0 }
 0x149   :  { %v1618_v62 = vpop.eup %1617  ;;  %v522_v63 = vadd.f32 %v2084_v43, %v521_v61  ;;  %v623_v0 = vpack.c.bf16 %v1616_v59, %v1612_v55  ;;  %1629 = vtanh.f32 %v530_v58 }
 0x14a   :  { %v624_v1 = vpack.c.bf16 %v1614_v57, %v1618_v62 }
 0x14b   :  { %1631 = vtanh.f32 %v522_v63  ;;  %1482 = vmatprep.mubr.bf16.mxu1 %v623_v0 }
 0x14c   :  { %1633 = vtanh.f32 %v527_v60  ;;  %1483 = vmatmul.mubr.bf16.gmra.mxu1 %v624_v1  ;;  %v1620_v2 = vpop.eup %1619 }
 0x14e   :  { %v1622_v3 = vpop.eup %1621 }
 0x150   :  { %v1624_v4 = vpop.eup %1623 }
 0x151   :  { %v1626_v5 = vpop.eup %1625  ;;  %v625_v6 = vpack.c.bf16 %v1624_v4, %v1620_v2 }
 0x152   :  { %v626_v7 = vpack.c.bf16 %v1622_v3, %v1626_v5 }
 0x153   :  { %1486 = vmatprep.mubr.bf16.mxu1 %v625_v6 }
 0x154   :  { %1487 = vmatmul.mubr.bf16.gmra.mxu1 %v626_v7  ;;  %v1628_v8 = vpop.eup %1627 }
 0x156   :  { %v1630_v9 = vpop.eup %1629 }
 0x158   :  { %v1632_v10 = vpop.eup %1631 }
 0x159   :  { %v1634_v11 = vpop.eup %1633  ;;  %v627_v43 = vpack.c.bf16 %v1632_v10, %v1628_v8 }
 0x15a   :  { %v628_v12 = vpack.c.bf16 %v1630_v9, %v1634_v11 }
 0x15b   :  { %1490 = vmatprep.mubr.bf16.mxu1 %v627_v43 }
 0x15c   :  { %1491 = vmatmul.mubr.bf16.gmra.mxu1 %v628_v12 }
 0x1a4   :  { %v1432_v14 = vpop.f32.mrf.mxu1 }
 0x1a5   :  { %v743_v15 = vadd.f32 %v1432_v14, %v2153_v13 }
 0x1a6   :  { %v734_v16 = vpop.f32.mrf.mxu1 }
 0x1a7   :  { %v735_v17 = vadd.f32 %v2153_v13, %v734_v16  ;;  %1635 = vtanh.f32 %v743_v15 }
 0x1a8   :  { %v1433_v18 = vpop.f32.mrf.mxu1 }
 0x1a9   :  { %v746_v19 = vadd.f32 %v1433_v18, %v2153_v13 }
 0x1aa   :  { %v737_v20 = vpop.f32.mrf.mxu1 }
 0x1ab   :  { %1637 = vtanh.f32 %v746_v19  ;;  %v738_v21 = vadd.f32 %v2153_v13, %v737_v20 }
 0x1ac   :  { %1639 = vtanh.f32 %v735_v17  ;;  %v1436_v22 = vpop.f32.mrf.mxu1 }
 0x1ad   :  { %1641 = vtanh.f32 %v738_v21  ;;  %v759_v23 = vadd.f32 %v1436_v22, %v2153_v13 }
 0x1ae   :  { %v750_v24 = vpop.f32.mrf.mxu1 }
 0x1af   :  { %v751_v25 = vadd.f32 %v2153_v13, %v750_v24  ;;  %1643 = vtanh.f32 %v759_v23 }
 0x1b0   :  { %v1437_v26 = vpop.f32.mrf.mxu1 }
 0x1b1   :  { %v762_v27 = vadd.f32 %v1437_v26, %v2153_v13 }
 0x1b2   :  { %v753_v28 = vpop.f32.mrf.mxu1 }
 0x1b3   :  { %1645 = vtanh.f32 %v762_v27  ;;  %v754_v29 = vadd.f32 %v2153_v13, %v753_v28 }
 0x1b4   :  { %1647 = vtanh.f32 %v751_v25  ;;  %v2163_v30 = vpop.f32.mrf.mxu1  ;;  %v2167_v32 = vpop.eup %1635 }
 0x1b5   :  { %1649 = vtanh.f32 %v754_v29  ;;  %v775_v29 = vadd.f32 %v2163_v30, %v2153_v13 }
 0x1b6   :  { %v2165_v31 = vpop.f32.mrf.mxu1 }
 0x1b8   :  { %v2169_v33 = vpop.eup %1637  ;;  %v2171_v34 = vpop.f32.mrf.mxu1 }
 0x1b9   :  { %v2173_v35 = vpop.eup %1639  ;;  %v1055_v36 = vpack.c.bf16 %v2169_v33, %v2167_v32 }
 0x1ba   :  { %v2177_v37 = vpop.eup %1641  ;;  %v2179_v38 = vpop.f32.mrf.mxu1 }
 0x1bb   :  { %v1054_v39 = vpack.c.bf16 %v2177_v37, %v2173_v35 }
 0x1bc   :  { %v1444_v40 = vpop.f32.mrf.mxu1  ;;  %v2183_v42 = vpop.eup %1643 }
 0x1bd   :  { %v791_v9 = vadd.f32 %v1444_v40, %v2153_v13 }
 0x1be   :  { %v782_v41 = vpop.f32.mrf.mxu1 }
 0x1bf   :  { %v783_v17 = vadd.f32 %v2153_v13, %v782_v41  ;;  %v778_v41 = vadd.f32 %v2171_v34, %v2153_v13 }
 0x1c0   :  { %v2185_v44 = vpop.eup %1645  ;;  %v1445_v45 = vpop.f32.mrf.mxu1 }
 0x1c1   :  { %v2187_v46 = vpop.eup %1647  ;;  %v1057_v47 = vpack.c.bf16 %v2185_v44, %v2183_v42  ;;  %v794_v11 = vadd.f32 %v1445_v45, %v2153_v13 }
 0x1c2   :  { %v2191_v48 = vpop.eup %1649  ;;  %v785_v49 = vpop.f32.mrf.mxu1 }
 0x1c3   :  { %v1056_v50 = vpack.c.bf16 %v2191_v48, %v2187_v46  ;;  %v786_v19 = vadd.f32 %v2153_v13, %v785_v49  ;;  %v2240_v49 = vld [vmem:[%s2401_s5] sm:$0xf] }
 0x1c4   :  { %v1448_v51 = vpop.f32.mrf.mxu1  ;;  %1326 = vmatprep.mubr.bf16.mxu0 %v2240_v49  ;;  %1344 = vmatprep.mubr.bf16.mxu1 %v2240_v49 }
 0x1c5   :  { %v807_v52 = vadd.f32 %v1448_v51, %v2153_v13 }
 0x1c6   :  { %v798_v53 = vpop.f32.mrf.mxu1 }
 0x1c7   :  { %v799_v54 = vadd.f32 %v2153_v13, %v798_v53  ;;  %1651 = vtanh.f32 %v807_v52 }
 0x1c8   :  { %v1449_v55 = vpop.f32.mrf.mxu1 }
 0x1c9   :  { %v810_v56 = vadd.f32 %v1449_v55, %v2153_v13 }
 0x1ca   :  { %v801_v57 = vpop.f32.mrf.mxu1 }
 0x1cb   :  { %1653 = vtanh.f32 %v810_v56  ;;  %v802_v58 = vadd.f32 %v2153_v13, %v801_v57 }
 0x1cc   :  { %1655 = vtanh.f32 %v799_v54  ;;  %v2199_v59 = vpop.f32.mrf.mxu1 }
 0x1cd   :  { %1657 = vtanh.f32 %v802_v58 }
 0x1ce   :  { %v2201_v60 = vpop.f32.mrf.mxu1  ;;  %1659 = vtanh.f32 %v791_v9 }
 0x1cf   :  { %1661 = vtanh.f32 %v794_v11 }
 0x1d0   :  { %v2203_v61 = vpop.f32.mrf.mxu1 }
 0x1d2   :  { %v2205_v62 = vpop.f32.mrf.mxu1 }
 0x1d4   :  { %v1456_v63 = vpop.f32.mrf.mxu1  ;;  %v2207_v1 = vpop.eup %1651 }
 0x1d5   :  { %v839_v21 = vadd.f32 %v1456_v63, %v2153_v13 }
 0x1d6   :  { %v830_v0 = vpop.f32.mrf.mxu1 }
 0x1d7   :  { %v831_v51 = vadd.f32 %v2153_v13, %v830_v0 }
 0x1d8   :  { %v2209_v2 = vpop.eup %1653  ;;  %v1457_v3 = vpop.f32.mrf.mxu1 }
 0x1d9   :  { %v2211_v4 = vpop.eup %1655  ;;  %v1063_v5 = vpack.c.bf16 %v2209_v2, %v2207_v1  ;;  %v842_v23 = vadd.f32 %v1457_v3, %v2153_v13 }
 0x1da   :  { %v2215_v6 = vpop.eup %1657  ;;  %v833_v7 = vpop.f32.mrf.mxu1 }
 0x1db   :  { %v1062_v8 = vpack.c.bf16 %v2215_v6, %v2211_v4  ;;  %v1660_v30 = vpop.eup %1659  ;;  %v834_v53 = vadd.f32 %v2153_v13, %v833_v7 }
 0x1dc   :  { %v1460_v10 = vpop.f32.mrf.mxu1  ;;  %v1662_v34 = vpop.eup %1661 }
 0x1dd   :  { %v855_v43 = vadd.f32 %v1460_v10, %v2153_v13  ;;  %v1061_v11 = vpack.c.bf16 %v1662_v34, %v1660_v30 }
 0x1de   :  { %v846_v12 = vpop.f32.mrf.mxu1 }
 0x1df   :  { %v847_v14 = vadd.f32 %v2153_v13, %v846_v12  ;;  %1663 = vtanh.f32 %v855_v43 }
 0x1e0   :  { %v1461_v15 = vpop.f32.mrf.mxu1 }
 0x1e1   :  { %v858_v16 = vadd.f32 %v1461_v15, %v2153_v13  ;;  %v1086_v15 = vld [vmem:[%s2402_s6] sm:$0xff]  ;;  %s1786_s6 = smov [#allocation2]  }
 0x1e2   :  { %v849_v18 = vpop.f32.mrf.mxu1  ;;  %s1184_s30 = sshll.u32 %s1786_s6, 4  ;;  %s1185_s30 = int_to_ptr.vmem [resolvable:$true] %s1184_s30 }
 0x1e3   :  { %1665 = vtanh.f32 %v858_v16  ;;  %v850_v20 = vadd.f32 %v2153_v13, %v849_v18  ;;  %v1785_v18 = vmov 0   ;;  %s1763_s8 = scalar_lea.vmem %s1185_s30, 512  ;;  %p1768_p1 = scmp.lt.s32.totalorder %s1185_s30, %s1185_s30 }
 0x1e4   :  { %1667 = vtanh.f32 %v847_v14  ;;  %v1464_v22 = vpop.f32.mrf.mxu1  ;;  %1496 = vset.pattern.permute.xlu0 %v1785_v18  ;;  %p1764_p0 = scmp.ne.s32.totalorder %s1185_s30, %s1763_s8  ;;  %p1769_p2 = scmp.lt.s32.totalorder %s1763_s8, %s1763_s8 }
 0x1e5   :  { %1669 = vtanh.f32 %v850_v20  ;;  %v871_v24 = vadd.f32 %v1464_v22, %v2153_v13  ;;  %1089 = vperm.xlu0 %1496, %v1086_v15  }
 0x1e6   :  { %1671 = vtanh.f32 %v783_v17  ;;  %v862_v25 = vpop.f32.mrf.mxu1  ;;  %p1770_p3 = por %p1769_p2, %p1768_p1 }
 0x1e7   :  { %1673 = vtanh.f32 %v786_v19  ;;  %v863_v26 = vadd.f32 %v2153_v13, %v862_v25 }
 0x1e8   :  { %1675 = vtanh.f32 %v839_v21  ;;  %v1465_v27 = vpop.f32.mrf.mxu1  ;;  %v770_v21 = vadd.f32 %v2153_v13, %v2179_v38  ;;  %p1771_p4 = pnand %p1770_p3, %p1764_p0 }
 0x1e9   :  { %1677 = vtanh.f32 %v842_v23  ;;  %v874_v28 = vadd.f32 %v1465_v27, %v2153_v13 }
 0x1ea   :  { %1679 = vtanh.f32 %v871_v24  ;;  %v865_v40 = vpop.f32.mrf.mxu1  ;;  %v826_v24 = vadd.f32 %v2203_v61, %v2153_v13 }
 0x1eb   :  { %1681 = vtanh.f32 %v874_v28  ;;  %v866_v45 = vadd.f32 %v2153_v13, %v865_v40 }
 0x1ec   :  { %1683 = vtanh.f32 %v863_v26  ;;  %v1468_v52 = vpop.f32.mrf.mxu1  ;;  %v1664_v56 = vpop.eup %1663  ;;  %v767_v26 = vadd.f32 %v2153_v13, %v2165_v31 }
 0x1ed   :  { %1685 = vtanh.f32 %v866_v45  ;;  %v887_v54 = vadd.f32 %v1468_v52, %v2153_v13 }
 0x1ee   :  { %1687 = vtanh.f32 %v775_v29  ;;  %v878_v55 = vpop.f32.mrf.mxu1  ;;  %v823_v29 = vadd.f32 %v2199_v59, %v2153_v13 }
 0x1ef   :  { %1689 = vtanh.f32 %v778_v41  ;;  %v879_v58 = vadd.f32 %v2153_v13, %v878_v55  ;;  %v818_v55 = vadd.f32 %v2153_v13, %v2205_v62 }
 0x1f0   :  { %v1666_v57 = vpop.eup %1665  ;;  %1691 = vtanh.f32 %v831_v51  ;;  %v1469_v63 = vpop.f32.mrf.mxu1 }
 0x1f1   :  { %v1668_v0 = vpop.eup %1667  ;;  %1693 = vtanh.f32 %v834_v53  ;;  %v890_v3 = vadd.f32 %v1469_v63, %v2153_v13  ;;  %v1069_v9 = vpack.c.bf16 %v1666_v57, %v1664_v56  ;;  %v815_v63 = vadd.f32 %v2153_v13, %v2201_v60 }
 0x1f2   :  { %v1670_v10 = vpop.eup %1669  ;;  %1695 = vtanh.f32 %v887_v54  ;;  %v881_v7 = vpop.f32.mrf.mxu1 }
 0x1f3   :  { %v1672_v43 = vpop.eup %1671  ;;  %1697 = vtanh.f32 %v890_v3  ;;  %v882_v12 = vadd.f32 %v2153_v13, %v881_v7  ;;  %1310 = vmatprep.subr.bf16.mxu0 %v1069_v9  ;;  %v1068_v14 = vpack.c.bf16 %v1670_v10, %v1668_v0 }
 0x1f4   :  { %v1674_v16 = vpop.eup %1673  ;;  %1699 = vtanh.f32 %v879_v58  ;;  %v2253_v17 = vpop.f32.mrf.mxu1  ;;  %1311 = vmatpush3.bf16.xpose.msra.mxu0 %v1061_v11 }
 0x1f5   :  { %v1676_v19 = vpop.eup %1675  ;;  %1701 = vtanh.f32 %v882_v12  ;;  %1312 = vmatprep.subr.bf16.mxu0 %v1068_v14  ;;  %v1060_v61 = vpack.c.bf16 %v1674_v16, %v1672_v43 }
 0x1f6   :  { %v1678_v20 = vpop.eup %1677  ;;  %v2257_v22 = vpop.f32.mrf.mxu1  ;;  %1703 = vtanh.f32 %v770_v21 }
 0x1f7   :  { %v2259_v23 = vpop.eup %1679  ;;  %1705 = vtanh.f32 %v826_v24  ;;  %v1067_v51 = vpack.c.bf16 %v1678_v20, %v1676_v19 }
 0x1f8   :  { %v2263_v25 = vpop.eup %1681  ;;  %v2267_v27 = vpop.f32.mrf.mxu1  ;;  %1707 = vtanh.f32 %v767_v26 }
 0x1f9   :  { %v2269_v28 = vpop.eup %1683  ;;  %v1071_v38 = vpack.c.bf16 %v2263_v25, %v2259_v23  ;;  %1709 = vtanh.f32 %v823_v29 }
 0x1fa   :  { %v2275_v40 = vpop.eup %1685  ;;  %v2277_v41 = vpop.f32.mrf.mxu1  ;;  %1711 = vtanh.f32 %v818_v55 }
 0x1fb   :  { %v1688_v45 = vpop.eup %1687  ;;  %v1070_v31 = vpack.c.bf16 %v2275_v40, %v2269_v28  ;;  %1713 = vtanh.f32 %v815_v63 }
 0x1fc   :  { %v1690_v52 = vpop.eup %1689  ;;  %v1476_v30 = vpop.f32.mrf.mxu1  ;;  %1313 = vmatpush3.bf16.xpose.msra.mxu0 %v1060_v61 }
 0x1fd   :  { %v1692_v59 = vpop.eup %1691  ;;  %1314 = vmatprep.subr.bf16.mxu0 %v1067_v51  ;;  %v1059_v10 = vpack.c.bf16 %v1690_v52, %v1688_v45  ;;  %v919_v42 = vadd.f32 %v1476_v30, %v2153_v13 }
 0x1fe   :  { %v1694_v53 = vpop.eup %1693  ;;  %v2281_v34 = vpop.f32.mrf.mxu1 }
 0x1ff   :  { %v2283_v54 = vpop.eup %1695  ;;  %v1066_v7 = vpack.c.bf16 %v1694_v53, %v1692_v59  ;;  %v911_v1 = vadd.f32 %v2153_v13, %v2281_v34 }
 0x200   :  { %v2287_v56 = vpop.eup %1697  ;;  %v1477_v57 = vpop.f32.mrf.mxu1 }
 0x201   :  { %v2289_v58 = vpop.eup %1699  ;;  %v1073_v0 = vpack.c.bf16 %v2287_v56, %v2283_v54 }
 0x202   :  { %v2295_v3 = vpop.eup %1701  ;;  %v2297_v9 = vpop.f32.mrf.mxu1 }
 0x203   :  { %v1072_v62 = vpack.c.bf16 %v2295_v3, %v2289_v58  ;;  %v1704_v12 = vpop.eup %1703  ;;  %v914_v48 = vadd.f32 %v2153_v13, %v2297_v9 }
 0x204   :  { %v1480_v11 = vpop.f32.mrf.mxu1  ;;  %1315 = vmatpush3.bf16.xpose.msra.mxu0 %v1059_v10  ;;  %v1706_v14 = vpop.eup %1705 }
 0x205   :  { %1316 = vmatprep.subr.bf16.mxu0 %v1066_v7  ;;  %v935_v43 = vadd.f32 %v1480_v11, %v2153_v13  ;;  %v1708_v18 = vpop.eup %1707 }
 0x206   :  { %v926_v60 = vpop.f32.mrf.mxu1  ;;  %v1710_v20 = vpop.eup %1709  ;;  %v1058_v24 = vpack.c.bf16 %v1704_v12, %v1708_v18 }
 0x207   :  { %v927_v15 = vadd.f32 %v2153_v13, %v926_v60  ;;  %1715 = vtanh.f32 %v935_v43  ;;  %v1065_v29 = vpack.c.bf16 %v1706_v14, %v1710_v20  ;;  %v1712_v51 = vpop.eup %1711 }
 0x208   :  { %v1481_v16 = vpop.f32.mrf.mxu1  ;;  %v1714_v59 = vpop.eup %1713 }
 0x209   :  { %v938_v19 = vadd.f32 %v1481_v16, %v2153_v13  ;;  %v1064_v55 = vpack.c.bf16 %v1712_v51, %v1714_v59  ;;  %v895_v51 = vadd.f32 %v2153_v13, %v2257_v22 }
 0x20a   :  { %v929_v21 = vpop.f32.mrf.mxu1 }
 0x20b   :  { %1717 = vtanh.f32 %v938_v19  ;;  %v930_v26 = vadd.f32 %v2153_v13, %v929_v21 }
 0x20c   :  { %1719 = vtanh.f32 %v927_v15  ;;  %v2305_v61 = vpop.f32.mrf.mxu1  ;;  %1317 = vmatpush3.bf16.xpose.msra.mxu0 %v1058_v24 }
 0x20d   :  { %1721 = vtanh.f32 %v930_v26  ;;  %1318 = vmatprep.subr.bf16.mxu0 %v1065_v29 }
 0x20e   :  { %v2307_v45 = vpop.f32.mrf.mxu1  ;;  %1723 = vtanh.f32 %v919_v42 }
 0x20f   :  { %v943_v22 = vadd.f32 %v2153_v13, %v2307_v45 }
 0x210   :  { %v2309_v52 = vpop.f32.mrf.mxu1 }
 0x212   :  { %v2311_v53 = vpop.f32.mrf.mxu1 }
 0x214   :  { %v1488_v63 = vpop.f32.mrf.mxu1  ;;  %1319 = vmatpush3.bf16.xpose.msra.mxu0 %v1057_v47  ;;  %v2316_v7 = vpop.eup %1715  ;;  %v922_v47 = vadd.f32 %v1477_v57, %v2153_v13 }
 0x215   :  { %1320 = vmatprep.subr.bf16.mxu0 %v1064_v55  ;;  %v967_v2 = vadd.f32 %v1488_v63, %v2153_v13  ;;  %v951_v55 = vadd.f32 %v2305_v61, %v2153_v13 }
 0x216   :  { %v958_v10 = vpop.f32.mrf.mxu1  ;;  %1725 = vtanh.f32 %v922_v47 }
 0x217   :  { %v959_v57 = vadd.f32 %v2153_v13, %v958_v10 }
 0x218   :  { %v2318_v11 = vpop.eup %1717  ;;  %v1489_v43 = vpop.f32.mrf.mxu1 }
 0x219   :  { %v2320_v60 = vpop.eup %1719  ;;  %v1079_v12 = vpack.c.bf16 %v2318_v11, %v2316_v7 }
 0x21a   :  { %v2324_v14 = vpop.eup %1721  ;;  %v961_v15 = vpop.f32.mrf.mxu1 }
 0x21b   :  { %v1078_v16 = vpack.c.bf16 %v2324_v14, %v2320_v60  ;;  %v1724_v32 = vpop.eup %1723 }
 0x21c   :  { %v1492_v44 = vpop.f32.mrf.mxu1  ;;  %1321 = vmatpush3.bf16.xpose.msra.mxu0 %v1056_v50  ;;  %v970_v50 = vadd.f32 %v1489_v43, %v2153_v13 }
 0x21d   :  { %1322 = vmatprep.subr.bf16.mxu0 %v1063_v5  ;;  %v983_v18 = vadd.f32 %v1492_v44, %v2153_v13  ;;  %v962_v5 = vadd.f32 %v2153_v13, %v961_v15 }
 0x21e   :  { %v974_v19 = vpop.f32.mrf.mxu1 }
 0x21f   :  { %v975_v20 = vadd.f32 %v2153_v13, %v974_v19  ;;  %1727 = vtanh.f32 %v983_v18 }
 0x220   :  { %v1493_v21 = vpop.f32.mrf.mxu1 }
 0x221   :  { %v986_v30 = vadd.f32 %v1493_v21, %v2153_v13 }
 0x222   :  { %v977_v24 = vpop.f32.mrf.mxu1 }
 0x223   :  { %1729 = vtanh.f32 %v986_v30  ;;  %v978_v46 = vadd.f32 %v2153_v13, %v977_v24  ;;  %v1726_v33 = vpop.eup %1725 }
 0x224   :  { %1731 = vtanh.f32 %v975_v20  ;;  %1323 = vmatpush3.bf16.xpose.msra.mxu0 %v1055_v36  ;;  %v906_v36 = vadd.f32 %v2267_v27, %v2153_v13  ;;  %v1077_v35 = vpack.c.bf16 %v1726_v33, %v1724_v32  ;;  %v954_v27 = vadd.f32 %v2309_v52, %v2153_v13 }
 0x225   :  { %1733 = vtanh.f32 %v978_v46  ;;  %1324 = vmatprep.subr.bf16.mxu0 %v1062_v8  ;;  %v903_v8 = vadd.f32 %v2253_v17, %v2153_v13  ;;  %v946_v52 = vadd.f32 %v2153_v13, %v2311_v53 }
 0x226   :  { %1735 = vtanh.f32 %v914_v48 }
 0x227   :  { %1737 = vtanh.f32 %v970_v50 }
 0x228   :  { %1739 = vtanh.f32 %v911_v1 }
 0x229   :  { %1741 = vtanh.f32 %v967_v2 }
 0x22a   :  { %1743 = vtanh.f32 %v906_v36 }
 0x22b   :  { %1745 = vtanh.f32 %v962_v5 }
 0x22c   :  { %1325 = vmatpush3.bf16.xpose.msra.mxu0 %v1054_v39  ;;  %v1728_v4 = vpop.eup %1727  ;;  %1747 = vtanh.f32 %v903_v8  ;;  %v898_v39 = vadd.f32 %v2153_v13, %v2277_v41 }
 0x22d   :  { %1749 = vtanh.f32 %v959_v57 }
 0x22e   :  { %1751 = vtanh.f32 %v898_v39 }
 0x22f   :  { %1753 = vtanh.f32 %v954_v27 }
 0x230   :  { %v1730_v6 = vpop.eup %1729  ;;  %1755 = vtanh.f32 %v895_v51 }
 0x231   :  { %v1732_v34 = vpop.eup %1731  ;;  %v1085_v9 = vpack.c.bf16 %v1730_v6, %v1728_v4  ;;  %1757 = vtanh.f32 %v951_v55 }
 0x232   :  { %v1734_v26 = vpop.eup %1733  ;;  %1759 = vtanh.f32 %v946_v52 }
 0x233   :  { %1328 = vmatprep.subr.bf16.mxu1 %v1085_v9  ;;  %v1084_v37 = vpack.c.bf16 %v1734_v26, %v1732_v34  ;;  %1327 = vmatmul.mubr.bf16.vlgmr.msra.gmra.mxu0 %v2240_v49  ;;  %v1736_v17 = vpop.eup %1735  ;;  %1761 = vtanh.f32 %v943_v22 }
 0x234   :  { %1329 = vmatpush3.bf16.xpose.msra.mxu1 %v1077_v35  ;;  %v1738_v29 = vpop.eup %1737 }
 0x235   :  { %1330 = vmatprep.subr.bf16.mxu1 %v1084_v37  ;;  %v1740_v59 = vpop.eup %1739 }
 0x236   :  { %v1742_v63 = vpop.eup %1741  ;;  %v1076_v10 = vpack.c.bf16 %v1736_v17, %v1740_v59 }
 0x237   :  { %v1083_v43 = vpack.c.bf16 %v1738_v29, %v1742_v63  ;;  %v1744_v41 = vpop.eup %1743 }
 0x238   :  { %v1746_v15 = vpop.eup %1745 }
 0x239   :  { %v1748_v42 = vpop.eup %1747 }
 0x23a   :  { %v1750_v44 = vpop.eup %1749  ;;  %v1075_v61 = vpack.c.bf16 %v1744_v41, %v1748_v42 }
 0x23b   :  { %v1082_v47 = vpack.c.bf16 %v1746_v15, %v1750_v44  ;;  %v1752_v18 = vpop.eup %1751 }
 0x23c   :  { %1331 = vmatpush3.bf16.xpose.msra.mxu1 %v1076_v10  ;;  %v1754_v19 = vpop.eup %1753 }
 0x23d   :  { %1332 = vmatprep.subr.bf16.mxu1 %v1083_v43  ;;  %v1756_v20 = vpop.eup %1755 }
 0x23e   :  { %v1758_v21 = vpop.eup %1757  ;;  %v1074_v30 = vpack.c.bf16 %v1752_v18, %v1756_v20 }
 0x23f   :  { %v1081_v24 = vpack.c.bf16 %v1754_v19, %v1758_v21  ;;  %v1760_v53 = vpop.eup %1759 }
 0x240   :  { %v1762_v46 = vpop.eup %1761 }
 0x241   :  { %v1080_v48 = vpack.c.bf16 %v1760_v53, %v1762_v46 }
 0x244   :  { %1333 = vmatpush3.bf16.xpose.msra.mxu1 %v1075_v61 }
 0x245   :  { %1334 = vmatprep.subr.bf16.mxu1 %v1082_v47 }
 0x24c   :  { %1335 = vmatpush3.bf16.xpose.msra.mxu1 %v1074_v30 }
 0x24d   :  { %1336 = vmatprep.subr.bf16.mxu1 %v1081_v24 }
 0x254   :  { %1337 = vmatpush3.bf16.xpose.msra.mxu1 %v1073_v0 }
 0x255   :  { %1338 = vmatprep.subr.bf16.mxu1 %v1080_v48 }
 0x25c   :  { %1339 = vmatpush3.bf16.xpose.msra.mxu1 %v1072_v62 }
 0x25d   :  { %1340 = vmatprep.subr.bf16.mxu1 %v1079_v12 }
 0x260   :  { %v1090_v13 = vpop.permute.xlu0 %1089 }
 0x264   :  { %1341 = vmatpush3.bf16.xpose.msra.mxu1 %v1071_v38 }
 0x265   :  { %1342 = vmatprep.subr.bf16.mxu1 %v1078_v16 }
 0x26c   :  { %1343 = vmatpush3.bf16.xpose.msra.mxu1 %v1070_v31 }
 0x273   :  { %1345 = vmatmul.mubr.bf16.vlgmr.msra.gmra.mxu1 %v2240_v49 }
 0x2f3   :  { %v1126_v54 = vpop.f32.mrf.mxu0 }
 0x2f4   :  { %v1127_v56 = vadd.f32 %v1126_v54, %v1090_v13 }
 0x2f5   :  { %v1128_v58 = vpop.f32.mrf.mxu0 }
 0x2f6   :  { %v1129_v0 = vadd.f32 %v1128_v58, %v1090_v13  ;;  %1174 = vst [vmem:[#allocation2] sm:$0xff] %v1127_v56 }
 0x2f7   :  { %v1130_v3 = vpop.f32.mrf.mxu0 }
 0x2f8   :  { %1175 = vst [vmem:[#allocation2 + $0x8] sm:$0xff] %v1129_v0 }
 0x2f9   :  { %v1131_v23 = vpop.f32.mrf.mxu0 }
 0x333   :  { %v1167_v25 = vpop.f32.mrf.mxu1 }
 0x334   :  { %v1168_v38 = vadd.f32 %v1167_v25, %v1090_v13 }
 0x335   :  { %v1169_v62 = vpop.f32.mrf.mxu1 }
 0x336   :  { %v1170_v45 = vadd.f32 %v1169_v62, %v1090_v13  ;;  %1176 = vst [vmem:[#allocation2 + $0x10] sm:$0xff] %v1168_v38 }
 0x337   :  { %v1171_v28 = vpop.f32.mrf.mxu1 }
 0x338   :  { %1177 = vst [vmem:[#allocation2 + $0x18] sm:$0xff] %v1170_v45 }
 0x339   :  { %v1172_v49 = vpop.f32.mrf.mxu1 }
 0x33a   :  { %1774 = shalt.err (!%p1771_p4)
}
 0x33b   :  { %1187 = dma.vmem_to_hbm [thread:$0]  %s1185_s30, 512, %s2403_s7, [#allocation3]  }
 0x33c   :  { %1783 = dma.done.wait [#allocation3], 512  }
 0x33d   :  { %1784 = vsyncadd [#allocation3], 4294966784 }
 0x33e   :  { %1191 = vsyncpa [#allocation3], 1 }

</bundles_post_ra>
